<compile_context>
chip_gen: v7x
topology: tpu7x:2x2x1
jax: 0.10.0
libtpu: 0.0.40
codegen_flags: <defaults>
</compile_context>

<pallas_src>
import functools

import jax
import jax.numpy as jnp
from jax.experimental import pallas as pl
from jax.experimental.pallas import tpu as pltpu


# ---------------------------------------------------------------------------
# Kernel
# ---------------------------------------------------------------------------
def _local_agg_kernel(x_ref, pp_ref, sab_ref, o_ref, *, dim_r):
    x = x_ref[...]                              # (Bt, N, dim) f32
    _, N, dim = x.shape
    pp = pp_ref[...]                            # (9 + dim + dim_r, dim) packed params

    # Hoisted edge masks along the length axis (sublanes); reused by both convs.
    n_idx = jax.lax.broadcasted_iota(jnp.int32, (1, N, 1), 1)
    first = n_idx == 0
    last = n_idx == N - 1

    def shift_prev(a):                          # a[:, n-1, :], zero-padded at n == 0
        return jnp.where(first, 0.0, pltpu.roll(a, shift=1, axis=1))

    def shift_next(a):                          # a[:, n+1, :], zero-padded at n == N-1
        return jnp.where(last, 0.0, pltpu.roll(a, shift=N - 1, axis=1))

    def row(i):                                 # packed per-channel row -> (1, 1, dim)
        return pp[i:i + 1, :].reshape(1, 1, dim)

    # ---- depthwise Conv1d(k=3, pad=1, groups=dim) with BN pre-folded, + ReLU
    conv = row(0) * shift_prev(x) + row(1) * x + row(2) * shift_next(x) + row(3)
    local = jnp.maximum(conv, 0.0)                                   # (Bt, N, dim)

    # ---- channel attention: GAP -> 1x1 conv -> ReLU -> 1x1 conv -> sigmoid
    avg = jnp.mean(local, axis=1)                                    # (Bt, dim)
    w1t = pp[9:9 + dim, :dim_r]                                      # (dim, dim_r)
    w2t = pp[9 + dim:9 + dim + dim_r, :]                             # (dim_r, dim)
    b1 = pp[8:9, :dim_r]                                             # (1, dim_r)
    b2 = pp[7:8, :]                                                  # (1, dim)
    h = jnp.maximum(
        jnp.dot(avg, w1t, preferred_element_type=jnp.float32) + b1, 0.0)
    cw = jax.nn.sigmoid(
        jnp.dot(h, w2t, preferred_element_type=jnp.float32) + b2)    # (Bt, dim)

    # ---- spatial attention: Conv1d(dim -> 1, k=3, pad=1) -> sigmoid
    y = local * cw[:, None, :]                                       # (Bt, N, dim)
    t = row(4) * shift_prev(y) + row(5) * y + row(6) * shift_next(y)
    s = jnp.sum(t, axis=2, keepdims=True) + sab_ref[0, 0]            # (Bt, N, 1)
    sw = jax.nn.sigmoid(s)

    o_ref[...] = y * sw                                              # reuse y = local*cw


# ---------------------------------------------------------------------------
# Parameter packing (BN folded into the depthwise conv; one dense VMEM slab)
# ---------------------------------------------------------------------------
def pack_params(p, eps=1e-5):
    dim, _ = p["dw_w"].shape
    dim_r = p["ca_w1"].shape[0]
    bn_s = p["gamma"] / jnp.sqrt(p["var"] + eps)
    bn_b = p["beta"] - p["mean"] * bn_s
    dw_w = p["dw_w"] * bn_s[:, None]             # folded depthwise weights (dim, 3)
    dw_b = p["dw_b"] * bn_s + bn_b               # folded depthwise bias   (dim,)

    rows = jnp.stack(
        [dw_w[:, 0], dw_w[:, 1], dw_w[:, 2], dw_b,
         p["sa_w"][:, 0], p["sa_w"][:, 1], p["sa_w"][:, 2],
         p["ca_b2"],
         jnp.pad(p["ca_b1"], (0, dim - dim_r))], axis=0)              # (9, dim)
    w1t = jnp.pad(p["ca_w1"].T, ((0, 0), (0, dim - dim_r)))          # (dim, dim)
    w2t = p["ca_w2"].T                                               # (dim_r, dim)
    pp = jnp.concatenate([rows, w1t, w2t], axis=0).astype(jnp.float32)
    sab = jnp.reshape(p["sa_b"], (1, 1)).astype(jnp.float32)         # scalar -> SMEM
    return pp, sab, dim_r


def _choose_block_batch(B, N, dim, budget_bytes=8 * 1024 * 1024):
    # in + out, double-buffered, f32
    per_b = 4 * N * dim * 4
    bt = max(1, min(B, budget_bytes // max(per_b, 1)))
    # keep at least 2 grid steps when possible (v7x: 2 TCs; pipeline overlap)
    while bt > 1 and B // bt < 2:
        bt -= 1
    while B % bt != 0:
        bt -= 1
    return bt


# ---------------------------------------------------------------------------
# Wrapper
# ---------------------------------------------------------------------------
def local_aggregation(x_bnd, params, *, block_batch=None):
    """x_bnd: (B, N, dim) float32 -> (B, N, dim) float32 (same as the module)."""
    B, N, dim = x_bnd.shape
    pp, sab, dim_r = pack_params(params)
    R = pp.shape[0]
    bt = block_batch or _choose_block_batch(B, N, dim)

    kernel = functools.partial(_local_agg_kernel, dim_r=dim_r)
    return pl.pallas_call(
        kernel,
        out_shape=jax.ShapeDtypeStruct((B, N, dim), jnp.float32),
        grid=(B // bt,),
        in_specs=[
            pl.BlockSpec((bt, N, dim), lambda b: (b, 0, 0)),          # activations
            pl.BlockSpec((R, dim), lambda b: (0, 0)),                 # packed params
            pl.BlockSpec((1, 1), lambda b: (0, 0),
                         memory_space=pltpu.MemorySpace.SMEM),        # sa bias scalar
        ],
        out_specs=pl.BlockSpec((bt, N, dim), lambda b: (b, 0, 0)),
        compiler_params=pltpu.CompilerParams(
            dimension_semantics=("parallel",),
            vmem_limit_bytes=32 * 1024 * 1024,   # safe on v5e/v6e/v7x; blocks budgeted to ~8 MiB
        ),
    )(x_bnd.astype(jnp.float32), pp, sab)


# ---------------------------------------------------------------------------
# Raw (unfolded) parameters + pure-JAX reference (eval-mode BN)
# ---------------------------------------------------------------------------
def make_params(dim, kernel_size=3, reduction_ratio=8, seed=0):
    dim_r = dim // reduction_ratio
    k = jax.random.split(jax.random.PRNGKey(seed), 12)
    f32 = jnp.float32
    return dict(
        dw_w=(0.3 * jax.random.normal(k[0], (dim, kernel_size))).astype(f32),
        dw_b=(0.1 * jax.random.normal(k[1], (dim,))).astype(f32),
        gamma=(1.0 + 0.1 * jax.random.normal(k[2], (dim,))).astype(f32),
        beta=(0.1 * jax.random.normal(k[3], (dim,))).astype(f32),
        mean=(0.05 * jax.random.normal(k[4], (dim,))).astype(f32),
        var=(0.5 + jnp.abs(jax.random.normal(k[5], (dim,)))).astype(f32),
        ca_w1=(0.3 * jax.random.normal(k[6], (dim_r, dim))).astype(f32),
        ca_b1=(0.1 * jax.random.normal(k[7], (dim_r,))).astype(f32),
        ca_w2=(0.3 * jax.random.normal(k[8], (dim, dim_r))).astype(f32),
        ca_b2=(0.1 * jax.random.normal(k[9], (dim,))).astype(f32),
        sa_w=(0.3 * jax.random.normal(k[10], (dim, kernel_size))).astype(f32),
        sa_b=(0.1 * jax.random.normal(k[11], ())).astype(f32),
    )


def reference(x_bnd, p, eps=1e-5):
    """Pure-JAX reference of the module forward (eval-mode BN, raw params)."""
    x = jnp.transpose(x_bnd, (0, 2, 1))                               # (B, dim, N)
    B, dim, N = x.shape
    xp = jnp.pad(x, ((0, 0), (0, 0), (1, 1)))
    conv = (p["dw_w"][None, :, 0:1] * xp[:, :, 0:N]
            + p["dw_w"][None, :, 1:2] * xp[:, :, 1:N + 1]
            + p["dw_w"][None, :, 2:3] * xp[:, :, 2:N + 2]
            + p["dw_b"][None, :, None])
    bn_s = p["gamma"] / jnp.sqrt(p["var"] + eps)
    bn_b = p["beta"] - p["mean"] * bn_s
    local = jnp.maximum(conv * bn_s[None, :, None] + bn_b[None, :, None], 0.0)
    avg = jnp.mean(local, axis=2)                                     # (B, dim)
    h = jnp.maximum(avg @ p["ca_w1"].T + p["ca_b1"][None], 0.0)       # (B, dim_r)
    cw = jax.nn.sigmoid(h @ p["ca_w2"].T + p["ca_b2"][None])          # (B, dim)
    y = local * cw[:, :, None]
    yp = jnp.pad(y, ((0, 0), (0, 0), (1, 1)))
    s = (p["sa_w"][None, :, 0:1] * yp[:, :, 0:N]
         + p["sa_w"][None, :, 1:2] * yp[:, :, 1:N + 1]
         + p["sa_w"][None, :, 2:3] * yp[:, :, 2:N + 2]).sum(axis=1, keepdims=True)
    sw = jax.nn.sigmoid(s + p["sa_b"])
    return jnp.transpose(y * sw, (0, 2, 1))                           # (B, N, dim)


if __name__ == "__main__":
    B, N, dim = 2, 128, 32
    params = make_params(dim, kernel_size=3, reduction_ratio=8, seed=0)
    x = jax.random.normal(jax.random.PRNGKey(0), (B, N, dim), dtype=jnp.float32)

    out = jax.block_until_ready(local_aggregation(x, params))
    ref = jax.block_until_ready(reference(x, params))

    assert out.shape == (B, N, dim)
    assert jnp.allclose(out, ref, atol=1e-4, rtol=1e-4), "mismatch vs reference"
    print("KERNEL_OK")
</pallas_src>

<mosaic_0001>
module attributes {stable_mosaic.version = 11 : i64} {
  func.func @_local_agg_kernel(%arg0: i32, %arg1: memref<1x128x32xf32, #tpu.memory_space<vmem>>, %arg2: memref<45x32xf32, #tpu.memory_space<vmem>>, %arg3: memref<1x1xf32, #tpu.memory_space<smem>>, %arg4: memref<1x128x32xf32, #tpu.memory_space<vmem>>) attributes {dimension_semantics = [#tpu.dimension_semantics<parallel>], iteration_bounds = array<i64: 2>, scalar_prefetch = 0 : i64, scratch_operands = 0 : i64, tpu.core_type = #tpu.core_type<tc>, window_params = [{transform_indices = @transform_0, window_bounds = array<i64: 1, 128, 32>}, {pipeline_mode = #tpu.pipeline_mode<synchronous>, transform_indices = @transform_1, window_bounds = array<i64: 45, 32>}, {transform_indices = @transform_2, window_bounds = array<i64: 1, 1>}, {transform_indices = @transform_3, window_bounds = array<i64: 1, 128, 32>}]} {
    %c0 = arith.constant 0 : index
    %c0_0 = arith.constant 0 : index
    %c0_1 = arith.constant 0 : index
    %0 = vector.load %arg1[%c0, %c0_0, %c0_1] : memref<1x128x32xf32, #tpu.memory_space<vmem>>, vector<1x128x32xf32>
    %c0_2 = arith.constant 0 : index
    %c0_3 = arith.constant 0 : index
    %1 = vector.load %arg2[%c0_2, %c0_3] : memref<45x32xf32, #tpu.memory_space<vmem>>, vector<45x32xf32>
    %2 = tpu.iota {dimensions = array<i32: 1>} : vector<1x128x1xi32>
    %c0_i32 = arith.constant 0 : i32
    %3 = vector.broadcast %c0_i32 : i32 to vector<1x128x1xi32>
    %4 = arith.cmpi eq, %2, %3 : vector<1x128x1xi32>
    %c127_i32 = arith.constant 127 : i32
    %5 = vector.broadcast %c127_i32 : i32 to vector<1x128x1xi32>
    %6 = arith.cmpi eq, %2, %5 : vector<1x128x1xi32>
    %7 = vector.extract_strided_slice %1 {offsets = [0, 0], sizes = [1, 32], strides = [1, 1]} : vector<45x32xf32> to vector<1x32xf32>
    %8 = vector.shape_cast %7 : vector<1x32xf32> to vector<1x1x32xf32>
    %c1_i32 = arith.constant 1 : i32
    %9 = tpu.dynamic_rotate %0 by %c1_i32 dim 1 : vector<1x128x32xf32>, i32 -> vector<1x128x32xf32>
    %cst = arith.constant 0.000000e+00 : f32
    %10 = vector.shape_cast %4 : vector<1x128x1xi1> to vector<1x128x1xi1>
    %11 = vector.broadcast %10 : vector<1x128x1xi1> to vector<1x128x32xi1>
    %12 = vector.broadcast %cst : f32 to vector<1x128x32xf32>
    %13 = arith.select %11, %12, %9 : vector<1x128x32xi1>, vector<1x128x32xf32>
    %14 = vector.broadcast %8 : vector<1x1x32xf32> to vector<1x128x32xf32>
    %15 = arith.mulf %14, %13 : vector<1x128x32xf32>
    %16 = vector.extract_strided_slice %1 {offsets = [1, 0], sizes = [1, 32], strides = [1, 1]} : vector<45x32xf32> to vector<1x32xf32>
    %17 = vector.shape_cast %16 : vector<1x32xf32> to vector<1x1x32xf32>
    %18 = vector.broadcast %17 : vector<1x1x32xf32> to vector<1x128x32xf32>
    %19 = arith.mulf %18, %0 : vector<1x128x32xf32>
    %20 = arith.addf %15, %19 : vector<1x128x32xf32>
    %21 = vector.extract_strided_slice %1 {offsets = [2, 0], sizes = [1, 32], strides = [1, 1]} : vector<45x32xf32> to vector<1x32xf32>
    %22 = vector.shape_cast %21 : vector<1x32xf32> to vector<1x1x32xf32>
    %c127_i32_4 = arith.constant 127 : i32
    %23 = tpu.dynamic_rotate %0 by %c127_i32_4 dim 1 : vector<1x128x32xf32>, i32 -> vector<1x128x32xf32>
    %cst_5 = arith.constant 0.000000e+00 : f32
    %24 = vector.shape_cast %6 : vector<1x128x1xi1> to vector<1x128x1xi1>
    %25 = vector.broadcast %24 : vector<1x128x1xi1> to vector<1x128x32xi1>
    %26 = vector.broadcast %cst_5 : f32 to vector<1x128x32xf32>
    %27 = arith.select %25, %26, %23 : vector<1x128x32xi1>, vector<1x128x32xf32>
    %28 = vector.broadcast %22 : vector<1x1x32xf32> to vector<1x128x32xf32>
    %29 = arith.mulf %28, %27 : vector<1x128x32xf32>
    %30 = arith.addf %20, %29 : vector<1x128x32xf32>
    %31 = vector.extract_strided_slice %1 {offsets = [3, 0], sizes = [1, 32], strides = [1, 1]} : vector<45x32xf32> to vector<1x32xf32>
    %32 = vector.shape_cast %31 : vector<1x32xf32> to vector<1x1x32xf32>
    %33 = vector.broadcast %32 : vector<1x1x32xf32> to vector<1x128x32xf32>
    %34 = arith.addf %30, %33 : vector<1x128x32xf32>
    %cst_6 = arith.constant 0.000000e+00 : f32
    %35 = vector.broadcast %cst_6 : f32 to vector<1x128x32xf32>
    %36 = arith.maximumf %34, %35 : vector<1x128x32xf32>
    %cst_7 = arith.constant dense<0.000000e+00> : vector<1x32xf32>
    %37 = vector.multi_reduction <add>, %36, %cst_7 [1] : vector<1x128x32xf32> to vector<1x32xf32>
    %cst_8 = arith.constant 1.280000e+02 : f32
    %38 = vector.broadcast %cst_8 : f32 to vector<1x32xf32>
    %39 = arith.divf %37, %38 : vector<1x32xf32>
    %40 = vector.extract_strided_slice %1 {offsets = [9, 0], sizes = [32, 4], strides = [1, 1]} : vector<45x32xf32> to vector<32x4xf32>
    %41 = vector.extract_strided_slice %1 {offsets = [41, 0], sizes = [4, 32], strides = [1, 1]} : vector<45x32xf32> to vector<4x32xf32>
    %42 = vector.extract_strided_slice %1 {offsets = [8, 0], sizes = [1, 4], strides = [1, 1]} : vector<45x32xf32> to vector<1x4xf32>
    %43 = vector.extract_strided_slice %1 {offsets = [7, 0], sizes = [1, 32], strides = [1, 1]} : vector<45x32xf32> to vector<1x32xf32>
    %cst_9 = arith.constant dense<0.000000e+00> : vector<1x4xf32>
    %44 = tpu.matmul %39, %40, %cst_9 {dimension_numbers = #tpu.dot_dimension_numbers<[1], [0], [0], [1], [0, 0, 1, 1], [], []>} : vector<1x32xf32>, vector<32x4xf32>, vector<1x4xf32> -> vector<1x4xf32>
    %45 = arith.addf %44, %42 : vector<1x4xf32>
    %cst_10 = arith.constant 0.000000e+00 : f32
    %46 = vector.broadcast %cst_10 : f32 to vector<1x4xf32>
    %47 = arith.maximumf %45, %46 : vector<1x4xf32>
    %cst_11 = arith.constant dense<0.000000e+00> : vector<1x32xf32>
    %48 = tpu.matmul %47, %41, %cst_11 {dimension_numbers = #tpu.dot_dimension_numbers<[1], [0], [0], [1], [0, 0, 1, 1], [], []>} : vector<1x4xf32>, vector<4x32xf32>, vector<1x32xf32> -> vector<1x32xf32>
    %49 = arith.addf %48, %43 : vector<1x32xf32>
    %50 = arith.negf %49 : vector<1x32xf32>
    %51 = math.exp %50 : vector<1x32xf32>
    %cst_12 = arith.constant 1.000000e+00 : f32
    %52 = vector.broadcast %cst_12 : f32 to vector<1x32xf32>
    %53 = arith.addf %52, %51 : vector<1x32xf32>
    %54 = arith.divf %52, %53 : vector<1x32xf32>
    %55 = vector.shape_cast %54 : vector<1x32xf32> to vector<1x1x32xf32>
    %56 = vector.broadcast %55 : vector<1x1x32xf32> to vector<1x128x32xf32>
    %57 = arith.mulf %36, %56 : vector<1x128x32xf32>
    %58 = vector.extract_strided_slice %1 {offsets = [4, 0], sizes = [1, 32], strides = [1, 1]} : vector<45x32xf32> to vector<1x32xf32>
    %59 = vector.shape_cast %58 : vector<1x32xf32> to vector<1x1x32xf32>
    %c1_i32_13 = arith.constant 1 : i32
    %60 = tpu.dynamic_rotate %57 by %c1_i32_13 dim 1 : vector<1x128x32xf32>, i32 -> vector<1x128x32xf32>
    %cst_14 = arith.constant 0.000000e+00 : f32
    %61 = vector.shape_cast %4 : vector<1x128x1xi1> to vector<1x128x1xi1>
    %62 = vector.broadcast %61 : vector<1x128x1xi1> to vector<1x128x32xi1>
    %63 = vector.broadcast %cst_14 : f32 to vector<1x128x32xf32>
    %64 = arith.select %62, %63, %60 : vector<1x128x32xi1>, vector<1x128x32xf32>
    %65 = vector.broadcast %59 : vector<1x1x32xf32> to vector<1x128x32xf32>
    %66 = arith.mulf %65, %64 : vector<1x128x32xf32>
    %67 = vector.extract_strided_slice %1 {offsets = [5, 0], sizes = [1, 32], strides = [1, 1]} : vector<45x32xf32> to vector<1x32xf32>
    %68 = vector.shape_cast %67 : vector<1x32xf32> to vector<1x1x32xf32>
    %69 = vector.broadcast %68 : vector<1x1x32xf32> to vector<1x128x32xf32>
    %70 = arith.mulf %69, %57 : vector<1x128x32xf32>
    %71 = arith.addf %66, %70 : vector<1x128x32xf32>
    %72 = vector.extract_strided_slice %1 {offsets = [6, 0], sizes = [1, 32], strides = [1, 1]} : vector<45x32xf32> to vector<1x32xf32>
    %73 = vector.shape_cast %72 : vector<1x32xf32> to vector<1x1x32xf32>
    %c127_i32_15 = arith.constant 127 : i32
    %74 = tpu.dynamic_rotate %57 by %c127_i32_15 dim 1 : vector<1x128x32xf32>, i32 -> vector<1x128x32xf32>
    %cst_16 = arith.constant 0.000000e+00 : f32
    %75 = vector.shape_cast %6 : vector<1x128x1xi1> to vector<1x128x1xi1>
    %76 = vector.broadcast %75 : vector<1x128x1xi1> to vector<1x128x32xi1>
    %77 = vector.broadcast %cst_16 : f32 to vector<1x128x32xf32>
    %78 = arith.select %76, %77, %74 : vector<1x128x32xi1>, vector<1x128x32xf32>
    %79 = vector.broadcast %73 : vector<1x1x32xf32> to vector<1x128x32xf32>
    %80 = arith.mulf %79, %78 : vector<1x128x32xf32>
    %81 = arith.addf %71, %80 : vector<1x128x32xf32>
    %cst_17 = arith.constant dense<0.000000e+00> : vector<1x128xf32>
    %82 = vector.multi_reduction <add>, %81, %cst_17 [2] : vector<1x128x32xf32> to vector<1x128xf32>
    %83 = vector.shape_cast %82 : vector<1x128xf32> to vector<1x128x1xf32>
    %c0_18 = arith.constant 0 : index
    %c0_19 = arith.constant 0 : index
    %84 = memref.load %arg3[%c0_18, %c0_19] : memref<1x1xf32, #tpu.memory_space<smem>>
    %85 = vector.broadcast %84 : f32 to vector<1x128x1xf32>
    %86 = arith.addf %83, %85 : vector<1x128x1xf32>
    %87 = arith.negf %86 : vector<1x128x1xf32>
    %88 = math.exp %87 : vector<1x128x1xf32>
    %cst_20 = arith.constant 1.000000e+00 : f32
    %89 = vector.broadcast %cst_20 : f32 to vector<1x128x1xf32>
    %90 = arith.addf %89, %88 : vector<1x128x1xf32>
    %91 = arith.divf %89, %90 : vector<1x128x1xf32>
    %92 = vector.broadcast %91 : vector<1x128x1xf32> to vector<1x128x32xf32>
    %93 = arith.mulf %57, %92 : vector<1x128x32xf32>
    %c0_21 = arith.constant 0 : index
    %c0_22 = arith.constant 0 : index
    %c0_23 = arith.constant 0 : index
    %94 = vector.load %arg4[%c0_21, %c0_22, %c0_23] : memref<1x128x32xf32, #tpu.memory_space<vmem>>, vector<1x128x32xf32>
    tpu.vector_store %arg4[%c0_21, %c0_22, %c0_23], %93 {strides = array<i32>} : memref<1x128x32xf32, #tpu.memory_space<vmem>>, vector<1x128x32xf32>,
    return
  }
  func.func @transform_0(%arg0: i32) -> (i32, i32, i32) {
    %c0_i32 = arith.constant 0 : i32
    %c0_i32_0 = arith.constant 0 : i32
    %c0_i32_1 = arith.constant 0 : i32
    return %arg0, %c0_i32, %c0_i32_0 : i32, i32, i32
  }
  func.func @transform_1(%arg0: i32) -> (i32, i32) {
    %c0_i32 = arith.constant 0 : i32
    %c0_i32_0 = arith.constant 0 : i32
    %c0_i32_1 = arith.constant 0 : i32
    return %c0_i32, %c0_i32_0 : i32, i32
  }
  func.func @transform_2(%arg0: i32) -> (i32, i32) {
    %c0_i32 = arith.constant 0 : i32
    %c0_i32_0 = arith.constant 0 : i32
    %c0_i32_1 = arith.constant 0 : i32
    return %c0_i32, %c0_i32_0 : i32, i32
  }
  func.func @transform_3(%arg0: i32) -> (i32, i32, i32) {
    %c0_i32 = arith.constant 0 : i32
    %c0_i32_0 = arith.constant 0 : i32
    %c0_i32_1 = arith.constant 0 : i32
    return %arg0, %c0_i32, %c0_i32_0 : i32, i32, i32
  }
}

</mosaic_0001>

<bundles_post_ra>
// kernel: tpu_custom_call.1
= control target key start
LH: loop header
LB: loop body
LE: loop exit
PB: predicated region body
PF: predicated region fallthrough
CT: control target
= control target key end

     0   :  { %s1384_s14 = smov 0   ;;  %s2154_s0 = inlined_call_operand.vmem [shape: f32[2,128,32], index: 0, kind: input, shape index: {}]   ;;  %s2155_s1 = inlined_call_operand.vmem [shape: f32[45,32], index: 1, kind: input, shape index: {}]   ;;  %s2156_s2 = inlined_call_operand.<no memory space> [shape: f32[1,1], index: 2, kind: input, shape index: {}]   ;;  %s2157_s3 = inlined_call_operand.vmem [shape: f32[2,128,32], index: 3, kind: output, shape index: {}]  }
   0x1   :  { %8 = sst [smem:[#allocation2]] %s2156_s2 }
   0x2 LB: > { %s1209_s15 = sadd.s32 4294967295, %s1356_s14   ;;  %p1213_p0 = scmp.ge.s32.totalorder %s1356_s14, 1  ;;  %s1356_s14 = sphi %s1384_s14, %s14_s14  }
   0x3   : > { %p138_p1 = scmp.lt.s32.totalorder %s1356_s14, 3 }
   0x5   : > { %p139_p2 = pnand %p1213_p0, %p138_p1 }
   0x6   : > { %v1395_v0 = vld [vmem:[%s2155_s1 + $0x8] sm:$0xff] (!%p139_p2)  ;;  %v190_v1 = vld [vmem:[%s2155_s1 + $0x10] sm:$0xff] (!%p139_p2)  ;;  %v191_v2 = vld [vmem:[%s2155_s1 + $0x18] sm:$0xff] (!%p139_p2)  ;;  %vm578_vm0 = vcmask (!%p139_p2), 1046528   ;;  %v1358_v3 = vmov (!%p139_p2), 0.0|0.0   ;;  %p162_p3 = scmp.lt.s32.totalorder (!%p139_p2), %s1209_s15, 1  ;;  %v194_v18 = vlaneseq (!%p139_p2) }
   0x7   : > { %142 = sbr.rel (%p139_p2) target bundleno = 782 (0x30e), region = 32  ;;  %1265 = vmatprep.subr.bf16.mxu0 (!%p139_p2), %v1358_v3  ;;  %v579_v4 = vrot.slane (!%p139_p2), %v1395_v0, 1  ;;  %v580_v5 = vrot.slane (!%p139_p2), %v190_v1, 1  ;;  %v582_v6 = vrot.slane (!%p139_p2), %v191_v2, 1  ;;  %v192_v7 = vld [vmem:[%s2155_s1 + $0x20] sm:$0xff] (!%p139_p2)  ;;  %vm1359_vm1 = vmmov (!%p139_p2), 0  }
   0x8   : > { %v1410_v8 = vld [vmem:[%s2155_s1 + $0x28] sm:$0x1f] (!%p139_p2)  ;;  %v584_v9 = vrot.slane (!%p139_p2), %v192_v7, 1  ;;  %v1360_v13 = vmov (!%p139_p2), 0.0   ;;  %v1422_v19 = vshrl.u32 (!%p139_p2), %v194_v18, 7  ;;  %v1435_v22 = vld [vmem:[%s2155_s1] sm:$0xff] (!%p139_p2) }
   0x9   : > { %v2159_v10 = vrot.slane (!%p139_p2), %v1410_v8, 1  ;;  %v581_v11 = vsel (!%p139_p2), %vm578_vm0, %v579_v4, %v580_v5  ;;  %v583_v12 = vsel (!%p139_p2), %vm578_vm0, %v580_v5, %v582_v6  ;;  %1257 = vmatprep.mubr.msk.f32.mxu0 (!%p139_p2), %vm1359_vm1, %v1360_v13  ;;  %1260 = vmatprep.subr.mxu1 (!%p139_p2), %v1360_v13  ;;  %vm533_vm5 = vcmask (!%p139_p2), 261120   ;;  %s1008_s4 = sld [smem:[#allocation2]] (!%p139_p2) }
   0xa   : > { %v1266_v14 = vpack.c.bf16 (!%p139_p2), %v583_v12, %v581_v11  ;;  %v585_v15 = vsel (!%p139_p2), %vm578_vm0, %v582_v6, %v584_v9  ;;  %1262 = vmatprep.mubr.msk.f32.mxu1 (!%p139_p2), %vm1359_vm1, %v1360_v13  ;;  %v2158_v20 = vsub.s32 (!%p139_p2), 0, %v1422_v19  ;;  %v346_v23 = vsub.s32 (!%p139_p2), 1, %v1422_v19 }
   0xb   : > { %v587_v16 = vsel (!%p139_p2), %vm578_vm0, %v584_v9, %v2159_v10  ;;  %v463_v27 = vsub.s32 (!%p139_p2), 2, %v1422_v19  ;;  %v499_v31 = vsub.s32 (!%p139_p2), 3, %v1422_v19  ;;  %v1459_v35 = vadd.s32 (!%p139_p2), 120, %v1422_v19 }
   0xc   : > { %1267 = vmatpush3.bf16.msra.mxu0 (!%p139_p2), %v1266_v14  ;;  %v1269_v17 = vpack.c.bf16 (!%p139_p2), %v587_v16, %v585_v15  ;;  %vm211_vm2 = vcmp.eq.s32.totalorder (!%p139_p2), %v1422_v19, 0  ;;  %vm259_vm3 = vcmp.lt.s32.totalorder (!%p139_p2), %v1422_v19, 1  ;;  %v327_v36 = vrot.slane (!%p139_p2), %v1435_v22, %v2158_v20 }
   0xd   : > { %1268 = vmatprep.subr.bf16.mxu0 (!%p139_p2), %v1358_v3  ;;  %v1476_v43 = vrot.slane (!%p139_p2), %v1435_v22, %v346_v23  ;;  %v1488_v50 = vrot.slane (!%p139_p2), %v1435_v22, %v463_v27  ;;  %v1494_v54 = vrot.slane (!%p139_p2), %v1435_v22, %v499_v31  ;;  %vm396_vm4 = vcmp.lt.s32.totalorder (!%p139_p2), %v1422_v19, 7 }
   0xe   : > { %s2165_s15 = smov (!%p162_p3, %s1209_s15), 1  ;;  %vm242_vm6 = vcmp.eq.s32.totalorder %v1459_v35, 127  ;;  %vm673_vm7 = vcmask 1043456   ;;  %vm669_vm8 = vcmask 31744  }
   0xf   : > { %s1240_s25 = sshll.u32 %s2165_s15, 7 }
  0x10   : > { %1270 = vmatpush3.bf16.msra.mxu0 %v1269_v17  ;;  %s166_s28 = scalar_lea.vmem %s2154_s0, %s1240_s25  ;;  %s2096_s7 = scalar_lea.vmem %s2157_s3, %s1240_s25 }
  0x11   : > { %v1430_v21 = vld [vmem:[%s166_s28] sm:$0xff]  ;;  %v1438_v24 = vld [vmem:[%s166_s28 + $0x8] sm:$0xff]  ;;  %v1440_v25 = vld [vmem:[%s166_s28 + $0x10] sm:$0xff] }
  0x12   : > { %v1442_v26 = vld [vmem:[%s166_s28 + $0x78] sm:$0xff]  ;;  %v1447_v29 = vld [vmem:[%s166_s28 + $0x28] sm:$0xff]  ;;  %v1449_v30 = vld [vmem:[%s166_s28 + $0x40] sm:$0xff]  ;;  %v243_v40 = vrot.slane %v1430_v21, 7  ;;  %v244_v41 = vrot.slane %v1438_v24, 7  ;;  %v245_v47 = vrot.slane %v1440_v25, 7  ;;  %v348_v3 = vmul.f32 %v1476_v43, %v1430_v21 }
  0x13   : > { %v1445_v28 = vld [vmem:[%s166_s28 + $0x18] sm:$0xff]  ;;  %v1452_v32 = vld [vmem:[%s166_s28 + $0x20] sm:$0xff]  ;;  %v1454_v33 = vld [vmem:[%s166_s28 + $0x50] sm:$0xff]  ;;  %v258_v42 = vrot.slane %v1442_v26, 7  ;;  %v248_v48 = vrot.slane %v1447_v29, 7  ;;  %v251_v49 = vrot.slane %v1449_v30, 7 }
  0x14   : > { %v1456_v34 = vld [vmem:[%s166_s28 + $0x58] sm:$0xff]  ;;  %v1466_v37 = vld [vmem:[%s166_s28 + $0x30] sm:$0xff]  ;;  %v1470_v39 = vld [vmem:[%s166_s28 + $0x48] sm:$0xff]  ;;  %v246_v51 = vrot.slane %v1445_v28, 7  ;;  %v253_v52 = vrot.slane %v1454_v33, 7  ;;  %v247_v55 = vrot.slane %v1452_v32, 7  ;;  %v273_v2 = vsel %vm259_vm3, %v244_v41, %v245_v47 }
  0x15   : > { %v1468_v38 = vld [vmem:[%s166_s28 + $0x38] sm:$0xff]  ;;  %v1478_v44 = vld [vmem:[%s166_s28 + $0x60] sm:$0xff]  ;;  %v1480_v45 = vld [vmem:[%s166_s28 + $0x68] sm:$0xff]  ;;  %v254_v53 = vrot.slane %v1456_v34, 7  ;;  %v249_v56 = vrot.slane %v1466_v37, 7  ;;  %v252_v58 = vrot.slane %v1470_v39, 7  ;;  %v275_v62 = vsel %vm259_vm3, %v258_v42, %v243_v40 }
  0x16   : > { %v1482_v46 = vld [vmem:[%s166_s28 + $0x70] sm:$0xff]  ;;  %v250_v57 = vrot.slane %v1468_v38, 7  ;;  %v255_v59 = vrot.slane %v1478_v44, 7  ;;  %v256_v60 = vrot.slane %v1480_v45, 7  ;;  %v270_v1 = vsel %vm259_vm3, %v247_v55, %v248_v48 }
  0x17   : > { %v257_v61 = vrot.slane %v1482_v46, 7  ;;  %v264_v4 = vsel %vm259_vm3, %v253_v52, %v254_v53  ;;  %v265_v5 = vsel %vm259_vm3, %v252_v58, %v253_v52  ;;  %v272_v6 = vsel %vm259_vm3, %v245_v47, %v246_v51 }
  0x18   : > { %v267_v63 = vsel %vm259_vm3, %v250_v57, %v251_v49  ;;  %v274_v7 = vsel %vm259_vm3, %v243_v40, %v244_v41  ;;  %v266_v9 = vsel %vm259_vm3, %v251_v49, %v252_v58  ;;  %v269_v11 = vsel %vm259_vm3, %v248_v48, %v249_v56 }
  0x19   : > { %v271_v12 = vsel %vm259_vm3, %v246_v51, %v247_v55  ;;  %v308_v13 = vsel %vm211_vm2, 0.0, %v275_v62  ;;  %v261_v14 = vsel %vm259_vm3, %v256_v60, %v257_v61  ;;  %v262_v15 = vsel %vm259_vm3, %v255_v59, %v256_v60 }
  0x1a   : > { %v263_v16 = vsel %vm259_vm3, %v254_v53, %v255_v59  ;;  %v268_v17 = vsel %vm259_vm3, %v249_v56, %v250_v57  ;;  %v260_v18 = vsel %vm259_vm3, %v257_v61, %v258_v42  ;;  %v329_v23 = vmul.f32 %v327_v36, %v274_v7 }
  0x1b   : > { %v330_v27 = vmul.f32 %v327_v36, %v273_v2  ;;  %v331_v31 = vmul.f32 %v327_v36, %v272_v6  ;;  %v328_v40 = vmul.f32 %v327_v36, %v308_v13  ;;  %v332_v41 = vmul.f32 %v327_v36, %v271_v12 }
  0x1c   : > { %v333_v47 = vmul.f32 %v327_v36, %v270_v1  ;;  %v334_v48 = vmul.f32 %v327_v36, %v269_v11  ;;  %v335_v49 = vmul.f32 %v327_v36, %v268_v17  ;;  %v1540_v51 = vmul.f32 %v327_v36, %v267_v63 }
  0x1d   : > { %v1542_v52 = vmul.f32 %v327_v36, %v266_v9  ;;  %v1544_v55 = vmul.f32 %v327_v36, %v265_v5  ;;  %v1546_v53 = vmul.f32 %v327_v36, %v264_v4  ;;  %v1548_v56 = vmul.f32 %v327_v36, %v263_v16 }
  0x1e   : > { %v1550_v57 = vmul.f32 %v327_v36, %v262_v15  ;;  %v1552_v42 = vmul.f32 %v327_v36, %v261_v14  ;;  %v1554_v58 = vmul.f32 %v327_v36, %v260_v18  ;;  %v381_v59 = vrot.slane %v1438_v24, 1 }
  0x1f   : > { %v382_v60 = vrot.slane %v1440_v25, 1  ;;  %v383_v61 = vrot.slane %v1445_v28, 1  ;;  %v349_v62 = vmul.f32 %v1476_v43, %v1438_v24  ;;  %v350_v63 = vmul.f32 %v1476_v43, %v1440_v25 }
  0x20   : > { %v2160_v1 = vrot.slane %v1430_v21, 1  ;;  %v384_v2 = vrot.slane %v1452_v32, 1  ;;  %v351_v36 = vmul.f32 %v1476_v43, %v1445_v28  ;;  %v352_v4 = vmul.f32 %v1476_v43, %v1452_v32 }
  0x21   : > { %v353_v5 = vmul.f32 %v1476_v43, %v1447_v29  ;;  %v354_v6 = vmul.f32 %v1476_v43, %v1466_v37  ;;  %v355_v24 = vmul.f32 %v1476_v43, %v1468_v38  ;;  %v356_v25 = vmul.f32 %v1476_v43, %v1449_v30 }
  0x22   : > { %v357_v7 = vmul.f32 %v1476_v43, %v1470_v39  ;;  %v385_v28 = vrot.slane %v1447_v29, 1  ;;  %v358_v32 = vmul.f32 %v1476_v43, %v1454_v33  ;;  %v364_v9 = vadd.f32 %v348_v3, %v328_v40 }
  0x23   : > { %v409_v11 = vsel %vm396_vm4, %v382_v60, %v383_v61  ;;  %v410_v12 = vsel %vm396_vm4, %v381_v59, %v382_v60  ;;  %v365_v13 = vadd.f32 %v349_v62, %v329_v23  ;;  %v386_v14 = vrot.slane %v1466_v37, 1 }
  0x24   : > { %v408_v15 = vsel %vm396_vm4, %v383_v61, %v384_v2  ;;  %v411_v29 = vsel %vm396_vm4, %v2160_v1, %v381_v59  ;;  %v366_v16 = vadd.f32 %v350_v63, %v330_v27  ;;  %v466_v17 = vmul.f32 %v1488_v50, %v410_v12 }
  0x25   : > { %v465_v3 = vmul.f32 %v1488_v50, %v411_v29  ;;  %v467_v18 = vmul.f32 %v1488_v50, %v409_v11  ;;  %v359_v23 = vmul.f32 %v1476_v43, %v1456_v34  ;;  %v1600_v37 = vmul.f32 %v1476_v43, %v1478_v44 }
  0x26   : > { %v387_v40 = vrot.slane %v1468_v38, 1  ;;  %v407_v60 = vsel %vm396_vm4, %v384_v2, %v385_v28  ;;  %v1607_v27 = vmul.f32 %v1476_v43, %v1480_v45  ;;  %v1611_v59 = vmul.f32 %v1476_v43, %v1482_v46 }
  0x27   : > { %v367_v61 = vadd.f32 %v351_v36, %v331_v31  ;;  %v468_v62 = vmul.f32 %v1488_v50, %v408_v15  ;;  %v388_v63 = vrot.slane %v1449_v30, 1  ;;  %v389_v11 = vrot.slane %v1470_v39, 1 }
  0x28   : > { %v406_v38 = vsel %vm396_vm4, %v385_v28, %v386_v14  ;;  %v481_v12 = vadd.f32 %v465_v3, %v364_v9  ;;  %v368_v2 = vadd.f32 %v352_v4, %v332_v41  ;;  %v469_v29 = vmul.f32 %v1488_v50, %v407_v60 }
  0x29   : > { %v482_v20 = vadd.f32 %v466_v17, %v365_v13  ;;  %v483_v10 = vadd.f32 %v467_v18, %v366_v16  ;;  %v1621_v1 = vmul.f32 %v1476_v43, %v1442_v26  ;;  %v369_v31 = vadd.f32 %v353_v5, %v333_v47 }
  0x2a   : > { %v370_v36 = vadd.f32 %v354_v6, %v334_v48  ;;  %v405_v30 = vsel %vm396_vm4, %v386_v14, %v387_v40  ;;  %v371_v39 = vadd.f32 %v355_v24, %v335_v49  ;;  %v390_v15 = vrot.slane %v1454_v33, 1 }
  0x2b   : > { %v470_v28 = vmul.f32 %v1488_v50, %v406_v38  ;;  %v484_v41 = vadd.f32 %v468_v62, %v367_v61  ;;  %v391_v4 = vrot.slane %v1456_v34, 1  ;;  %v403_v9 = vsel %vm396_vm4, %v388_v63, %v389_v11 }
  0x2c   : > { %v404_v43 = vsel %vm396_vm4, %v387_v40, %v388_v63  ;;  %v1633_v47 = vadd.f32 %v1494_v54, %v481_v12  ;;  %v471_v48 = vmul.f32 %v1488_v50, %v405_v30  ;;  %v485_v5 = vadd.f32 %v469_v29, %v368_v2 }
  0x2d   : > { %v1637_v49 = vadd.f32 %v1494_v54, %v482_v20  ;;  %v1640_v33 = vadd.f32 %v1494_v54, %v483_v10  ;;  %v372_v34 = vadd.f32 %v356_v25, %v1540_v51  ;;  %v373_v6 = vadd.f32 %v357_v7, %v1542_v52 }
  0x2e   : > { %v374_v24 = vadd.f32 %v358_v32, %v1544_v55  ;;  %v392_v13 = vrot.slane %v1478_v44, 1  ;;  %v393_v14 = vrot.slane %v1480_v45, 1  ;;  %v472_v16 = vmul.f32 %v1488_v50, %v404_v43 }
  0x2f   : > { %v486_v3 = vadd.f32 %v470_v28, %v369_v31  ;;  %v1650_v20 = vadd.f32 %v1494_v54, %v484_v41  ;;  %v401_v10 = vsel %vm396_vm4, %v390_v15, %v391_v4  ;;  %v402_v51 = vsel %vm396_vm4, %v389_v11, %v390_v15 }
  0x30   : > { %v473_v52 = vmul.f32 %v1488_v50, %v403_v9  ;;  %v517_v44 = vmax.f32 %v1633_v47, 0.0  ;;  %v487_v55 = vadd.f32 %v471_v48, %v370_v36  ;;  %v1659_v25 = vadd.f32 %v1494_v54, %v485_v5 }
  0x31   : > { %v518_v45 = vmax.f32 %v1637_v49, 0.0  ;;  %v519_v7 = vmax.f32 %v1640_v33, 0.0  ;;  %v375_v32 = vadd.f32 %v359_v23, %v1546_v53  ;;  %v394_v17 = vrot.slane %v1482_v46, 1 }
  0x32   : > { %v395_v18 = vrot.slane %v1442_v26, 1  ;;  %v400_v40 = vsel %vm396_vm4, %v391_v4, %v392_v13  ;;  %v474_v60 = vmul.f32 %v1488_v50, %v402_v51  ;;  %v488_v61 = vadd.f32 %v472_v16, %v371_v39 }
  0x33   : > { %v1670_v62 = vadd.f32 %v1494_v54, %v486_v3  ;;  %v520_v63 = vmax.f32 %v1650_v20, 0.0  ;;  %v399_v11 = vsel %vm396_vm4, %v392_v13, %v393_v14  ;;  %v475_v53 = vmul.f32 %v1488_v50, %v401_v10 }
  0x34   : > { %v489_v23 = vadd.f32 %v473_v52, %v372_v34  ;;  %v534_v26 = vsel %vm533_vm5, %v517_v44, 0.0  ;;  %v1680_v46 = vadd.f32 %v1494_v54, %v487_v55  ;;  %v521_v38 = vmax.f32 %v1659_v25, 0.0 }
  0x35   : > { %v535_v12 = vsel %vm533_vm5, %v518_v45, 0.0  ;;  %v537_v2 = vsel %vm533_vm5, %v519_v7, 0.0  ;;  %v398_v29 = vsel %vm396_vm4, %v393_v14, %v394_v17  ;;  %v2161_v31 = vrot.slane %v1430_v21, 1 }
  0x36   : > { %v476_v30 = vmul.f32 %v1488_v50, %v400_v40  ;;  %v536_v39 = vadd.f32 %v535_v12, %v534_v26  ;;  %v490_v15 = vadd.f32 %v474_v60, %v373_v6  ;;  %v1697_v28 = vadd.f32 %v1494_v54, %v488_v61 }
  0x37   : > { %v412_v36 = vsel %vm396_vm4, %v395_v18, %v2161_v31  ;;  %v522_v41 = vmax.f32 %v1670_v62, 0.0  ;;  %v539_v4 = vsel %vm533_vm5, %v520_v63, 0.0  ;;  %v376_v9 = vadd.f32 %v1600_v37, %v1548_v56 }
  0x38   : > { %v397_v21 = vsel %vm396_vm4, %v394_v17, %v395_v18  ;;  %v477_v43 = vmul.f32 %v1488_v50, %v399_v11  ;;  %v538_v48 = vadd.f32 %v537_v2, %v536_v39  ;;  %v491_v5 = vadd.f32 %v475_v53, %v374_v24 }
  0x39   : > { %v1709_v34 = vadd.f32 %v1494_v54, %v489_v23  ;;  %v523_v6 = vmax.f32 %v1680_v46, 0.0  ;;  %v541_v13 = vsel %vm533_vm5, %v521_v38, 0.0  ;;  %v377_v14 = vadd.f32 %v1607_v27, %v1550_v57 }
  0x3a   : > { %v460_v56 = vsel %vm242_vm6, 0.0, %v412_v36  ;;  %v478_v37 = vmul.f32 %v1488_v50, %v398_v29  ;;  %v540_v16 = vadd.f32 %v539_v4, %v538_v48  ;;  %v492_v3 = vadd.f32 %v476_v30, %v375_v32 }
  0x3b   : > { %v1721_v24 = vadd.f32 %v1494_v54, %v490_v15  ;;  %v524_v10 = vmax.f32 %v1697_v28, 0.0  ;;  %v543_v51 = vsel %vm533_vm5, %v522_v41, 0.0  ;;  %v378_v52 = vadd.f32 %v1611_v59, %v1552_v42 }
  0x3c   : > { %v479_v57 = vmul.f32 %v1488_v50, %v397_v21  ;;  %v542_v27 = vadd.f32 %v541_v13, %v540_v16  ;;  %v493_v55 = vadd.f32 %v477_v43, %v376_v9  ;;  %v1731_v17 = vadd.f32 %v1494_v54, %v491_v5 }
  0x3d   : > { %v525_v32 = vmax.f32 %v1709_v34, 0.0  ;;  %v545_v18 = vsel %vm533_vm5, %v523_v6, 0.0  ;;  %v379_v40 = vadd.f32 %v1621_v1, %v1554_v58  ;;  %v480_v60 = vmul.f32 %v1488_v50, %v460_v56 }
  0x3e   : > { %v544_v61 = vadd.f32 %v543_v51, %v542_v27  ;;  %v494_v42 = vadd.f32 %v478_v37, %v377_v14  ;;  %v1741_v59 = vadd.f32 %v1494_v54, %v492_v3  ;;  %v526_v11 = vmax.f32 %v1721_v24, 0.0 }
  0x3f   : > { %v547_v53 = vsel %vm533_vm5, %v524_v10, 0.0  ;;  %v495_v26 = vadd.f32 %v479_v57, %v378_v52  ;;  %v1748_v12 = vadd.f32 %v1494_v54, %v493_v55  ;;  %v527_v58 = vmax.f32 %v1731_v17, 0.0 }
  0x40   : > { %v546_v23 = vadd.f32 %v545_v18, %v544_v61  ;;  %v549_v50 = vsel %vm533_vm5, %v525_v32, 0.0  ;;  %v496_v2 = vadd.f32 %v480_v60, %v379_v40  ;;  %v1755_v29 = vadd.f32 %v1494_v54, %v494_v42 }
  0x41   : > { %v528_v31 = vmax.f32 %v1741_v59, 0.0  ;;  %v551_v36 = vsel %vm533_vm5, %v526_v11, 0.0  ;;  %v1762_v39 = vadd.f32 %v1494_v54, %v495_v26  ;;  %v529_v15 = vmax.f32 %v1748_v12, 0.0 }
  0x42   : > { %v548_v1 = vadd.f32 %v547_v53, %v546_v23  ;;  %v553_v4 = vsel %vm533_vm5, %v527_v58, 0.0  ;;  %v1769_v21 = vadd.f32 %v1494_v54, %v496_v2  ;;  %v530_v43 = vmax.f32 %v1755_v29, 0.0 }
  0x43   : > { %v555_v48 = vsel %vm533_vm5, %v528_v31, 0.0  ;;  %v531_v13 = vmax.f32 %v1762_v39, 0.0  ;;  %v557_v14 = vsel %vm533_vm5, %v529_v15, 0.0  ;;  %v2162_v23 = vrot.slane %v1410_v8, 1 }
  0x44   : > { %v550_v30 = vadd.f32 %v549_v50, %v548_v1  ;;  %v532_v37 = vmax.f32 %v1769_v21, 0.0  ;;  %v559_v54 = vsel %vm533_vm5, %v530_v43, 0.0  ;;  %v842_v8 = vsub.s32 5, %v1422_v19 }
  0x45   : > { %v561_v3 = vsel %vm533_vm5, %v531_v13, 0.0  ;;  %1261 = vmatpush3.msk.msra.mxu1 %vm673_vm7, %v2162_v23 }
  0x46   : > { %v552_v9 = vadd.f32 %v551_v36, %v550_v30  ;;  %v563_v52 = vsel %vm533_vm5, %v532_v37, 0.0  ;;  %v667_v36 = vrot.slane %v1435_v22, 7 }
  0x48   : > { %v554_v5 = vadd.f32 %v553_v4, %v552_v9 }
  0x4a   : > { %v556_v56 = vadd.f32 %v555_v48, %v554_v5 }
  0x4c   : > { %v558_v16 = vadd.f32 %v557_v14, %v556_v56  ;;  %v822_v56 = vsub.s32 4, %v1422_v19 }
  0x4e   : > { %v560_v51 = vadd.f32 %v559_v54, %v558_v16  ;;  %v2163_v16 = vsub.s32 0, %v1422_v19 }
  0x50   : > { %v562_v57 = vadd.f32 %v561_v3, %v560_v51  ;;  %v1802_v51 = vrot.slane %v1435_v22, %v842_v8 }
  0x52   : > { %v564_v27 = vadd.f32 %v563_v52, %v562_v57  ;;  %v1805_v52 = vrot.slane %v1435_v22, %v822_v56 }
  0x54   : > { %v565_v55 = vrot.slane %v564_v27, 4 }
  0x56   : > { %v566_v18 = vadd.f32 %v565_v55, %v564_v27 }
  0x58   : > { %v567_v40 = vrot.slane %v566_v18, 2 }
  0x5a   : > { %v568_v60 = vadd.f32 %v567_v40, %v566_v18 }
  0x5c   : > { %v569_v61 = vrot.slane %v568_v60, 1 }
  0x5e   : > { %v570_v42 = vadd.f32 %v569_v61, %v568_v60 }
  0x60   : > { %v572_v53 = vmul.f32 0.0078125, %v570_v42 }
  0x62   : > { %1258 = vmatmul.mubr.msk.f32.vlgmr.msra.gmra.mrb[0].mxu0 %vm533_vm5, %v572_v53 }
 0x135   : > { %v661_v26 = vpop.f32.mrb[0].mxu0 }
 0x136   : > { %v662_v50 = vadd.f32 %v661_v26, %v1395_v0  ;;  %v1259_v1 = vpop.f32.mrb[1].mxu0  ;;  %v926_v0 = vsub.s32 6, %v1422_v19  ;;  %v2078_v19 = vstv %s1008_s4 }
 0x138   : > { %v665_v2 = vmax.f32 %v662_v50, 0.0  ;;  %v1808_v57 = vrot.slane %v1435_v22, %v926_v0 }
 0x13a   : > { %1263 = vmatmul.mubr.msk.f32.vlgmr.msra.gmra.mrb[0].mxu1 %vm669_vm8, %v665_v2 }
 0x20d   : > { %v742_v30 = vpop.f32.mrb[0].mxu1 }
 0x20e   : > { %v743_v4 = vadd.f32 %v742_v30, %v667_v36  ;;  %v1264_v9 = vpop.f32.mrb[1].mxu1 }
 0x210   : > { %v1221_v48 = vmul.f32 -1.442695, %v743_v4 }
 0x212   : > { %1282 = vpow2.f32 %v1221_v48 }
 0x21c   : > { %v1283_v5 = vpop.eup %1282 }
 0x21d   : > { %v749_v14 = vadd.f32 1.0, %v1283_v5 }
 0x21f   : > { %1284 = vrcp.f32 %v749_v14 }
 0x229   : > { %v1285_v54 = vpop.eup %1284 }
 0x22a   : > { %v1799_v3 = vrot.slane %v1285_v54, %v2163_v16 }
 0x22c   : > { %v1813_v27 = vmul.f32 %v1799_v3, %v518_v45  ;;  %v1818_v55 = vmul.f32 %v1799_v3, %v519_v7  ;;  %v1823_v18 = vmul.f32 %v1799_v3, %v520_v63  ;;  %v1828_v22 = vmul.f32 %v1799_v3, %v517_v44 }
 0x22d   : > { %v1833_v49 = vmul.f32 %v1799_v3, %v521_v38  ;;  %v1838_v33 = vmul.f32 %v1799_v3, %v522_v41  ;;  %v1843_v20 = vmul.f32 %v1799_v3, %v523_v6  ;;  %v1848_v47 = vmul.f32 %v1799_v3, %v524_v10 }
 0x22e   : > { %v773_v44 = vrot.slane %v1813_v27, 7  ;;  %v774_v25 = vrot.slane %v1818_v55, 7  ;;  %v846_v45 = vmul.f32 %v1802_v51, %v1818_v55  ;;  %v878_v7 = vrot.slane %v1818_v55, 1 }
 0x22f   : > { %v879_v62 = vrot.slane %v1823_v18, 1  ;;  %v772_v63 = vrot.slane %v1828_v22, 7  ;;  %v845_v46 = vmul.f32 %v1802_v51, %v1813_v27  ;;  %v877_v38 = vrot.slane %v1813_v27, 1 }
 0x230   : > { %v801_v28 = vsel %vm259_vm3, %v773_v44, %v774_v25  ;;  %v775_v41 = vrot.slane %v1823_v18, 7  ;;  %v847_v6 = vmul.f32 %v1802_v51, %v1823_v18  ;;  %v880_v10 = vrot.slane %v1833_v49, 1 }
 0x231   : > { %v826_v40 = vmul.f32 %v1805_v52, %v801_v28  ;;  %v904_v60 = vsel %vm396_vm4, %v878_v7, %v879_v62  ;;  %v802_v61 = vsel %vm259_vm3, %v772_v63, %v773_v44  ;;  %v905_v42 = vsel %vm396_vm4, %v877_v38, %v878_v7 }
 0x232   : > { %v930_v53 = vmul.f32 %v1808_v57, %v904_v60  ;;  %v825_v23 = vmul.f32 %v1805_v52, %v802_v61  ;;  %v929_v26 = vmul.f32 %v1808_v57, %v905_v42  ;;  %v800_v50 = vsel %vm259_vm3, %v774_v25, %v775_v41 }
 0x233   : > { %v862_v1 = vadd.f32 %v846_v45, %v826_v40  ;;  %v827_v2 = vmul.f32 %v1805_v52, %v800_v50  ;;  %v903_v36 = vsel %vm396_vm4, %v879_v62, %v880_v10  ;;  %v776_v30 = vrot.slane %v1833_v49, 7 }
 0x234   : > { %v861_v4 = vadd.f32 %v845_v46, %v825_v23  ;;  %v931_v9 = vmul.f32 %v1808_v57, %v903_v36  ;;  %v848_v48 = vmul.f32 %v1802_v51, %v1833_v49  ;;  %v881_v5 = vrot.slane %v1838_v33, 1 }
 0x235   : > { %v946_v14 = vadd.f32 %v930_v53, %v862_v1  ;;  %v863_v8 = vadd.f32 %v847_v6, %v827_v2  ;;  %v799_v56 = vsel %vm259_vm3, %v775_v41, %v776_v30  ;;  %v777_v0 = vrot.slane %v1838_v33, 7 }
 0x236   : > { %v945_v54 = vadd.f32 %v929_v26, %v861_v4  ;;  %v828_v16 = vmul.f32 %v1805_v52, %v799_v56  ;;  %v902_v44 = vsel %vm396_vm4, %v880_v10, %v881_v5  ;;  %v849_v25 = vmul.f32 %v1802_v51, %v1838_v33 }
 0x237   : > { %v966_v45 = vsel %vm533_vm5, %v946_v14, 0.0  ;;  %v947_v7 = vadd.f32 %v931_v9, %v863_v8  ;;  %v932_v62 = vmul.f32 %v1808_v57, %v902_v44  ;;  %v798_v46 = vsel %vm259_vm3, %v776_v30, %v777_v0 }
 0x238   : > { %967 = vadd.xlane.f32.xlu1 %v966_v45  ;;  %v963_v28 = vsel %vm533_vm5, %v945_v54, 0.0  ;;  %v864_v41 = vadd.f32 %v848_v48, %v828_v16  ;;  %v829_v6 = vmul.f32 %v1805_v52, %v798_v46  ;;  %v882_v40 = vrot.slane %v1843_v20, 1 }
 0x239   : > { %964 = vadd.xlane.f32.xlu0 %v963_v28  ;;  %v969_v10 = vsel %vm533_vm5, %v947_v7, 0.0  ;;  %v778_v60 = vrot.slane %v1843_v20, 7  ;;  %v850_v61 = vmul.f32 %v1802_v51, %v1843_v20  ;;  %v883_v42 = vrot.slane %v1848_v47, 1 }
 0x23a   : > { %v948_v53 = vadd.f32 %v932_v62, %v864_v41  ;;  %v865_v23 = vadd.f32 %v849_v25, %v829_v6  ;;  %v901_v26 = vsel %vm396_vm4, %v881_v5, %v882_v40  ;;  %v1915_v50 = vmul.f32 %v1799_v3, %v525_v32 }
 0x23b   : > { %v933_v1 = vmul.f32 %v1808_v57, %v901_v26  ;;  %v797_v2 = vsel %vm259_vm3, %v777_v0, %v778_v60  ;;  %v900_v36 = vsel %vm396_vm4, %v882_v40, %v883_v42  ;;  %v779_v30 = vrot.slane %v1848_v47, 7 }
 0x23c   : > { %970 = vadd.xlane.f32.xlu1 %v969_v10  ;;  %v972_v4 = vsel %vm533_vm5, %v948_v53, 0.0  ;;  %v830_v9 = vmul.f32 %v1805_v52, %v797_v2  ;;  %v934_v34 = vmul.f32 %v1808_v57, %v900_v36  ;;  %v851_v32 = vmul.f32 %v1802_v51, %v1848_v47 }
 0x23d   : > { %973 = vadd.xlane.f32.xlu0 %v972_v4  ;;  %v949_v48 = vadd.f32 %v933_v1, %v865_v23  ;;  %v796_v5 = vsel %vm259_vm3, %v778_v60, %v779_v30  ;;  %v884_v14 = vrot.slane %v1915_v50, 1  ;;  %v1934_v8 = vmul.f32 %v1799_v3, %v526_v11 }
 0x23e   : > { %v866_v56 = vadd.f32 %v850_v61, %v830_v9  ;;  %v831_v0 = vmul.f32 %v1805_v52, %v796_v5  ;;  %v780_v54 = vrot.slane %v1915_v50, 7  ;;  %v852_v16 = vmul.f32 %v1802_v51, %v1915_v50 }
 0x23f   : > { %v975_v44 = vsel %vm533_vm5, %v949_v48, 0.0  ;;  %v899_v25 = vsel %vm396_vm4, %v883_v42, %v884_v14  ;;  %v885_v45 = vrot.slane %v1934_v8, 1  ;;  %v1947_v24 = vmul.f32 %v1799_v3, %v527_v58 }
 0x240   : > { %976 = vadd.xlane.f32.xlu1 %v975_v44  ;;  %v950_v11 = vadd.f32 %v934_v34, %v866_v56  ;;  %v867_v7 = vadd.f32 %v851_v32, %v831_v0  ;;  %v935_v62 = vmul.f32 %v1808_v57, %v899_v25  ;;  %v795_v46 = vsel %vm259_vm3, %v779_v30, %v780_v54 }
 0x241   : > { %v832_v28 = vmul.f32 %v1805_v52, %v795_v46  ;;  %v898_v41 = vsel %vm396_vm4, %v884_v14, %v885_v45  ;;  %v781_v6 = vrot.slane %v1934_v8, 7  ;;  %v853_v17 = vmul.f32 %v1802_v51, %v1934_v8 }
 0x242   : > { %v978_v58 = vsel %vm533_vm5, %v950_v11, 0.0  ;;  %v951_v40 = vadd.f32 %v935_v62, %v867_v7  ;;  %v936_v10 = vmul.f32 %v1808_v57, %v898_v41  ;;  %v886_v60 = vrot.slane %v1947_v24, 1 }
 0x243   : > { %979 = vadd.xlane.f32.xlu0 %v978_v58  ;;  %v868_v61 = vadd.f32 %v852_v16, %v832_v28  ;;  %v794_v42 = vsel %vm259_vm3, %v780_v54, %v781_v6  ;;  %v1966_v53 = vmul.f32 %v1799_v3, %v528_v31  ;;  %v782_v23 = vrot.slane %v1947_v24, 7 }
 0x244   : > { %v981_v26 = vsel %vm533_vm5, %v951_v40, 0.0  ;;  %v833_v1 = vmul.f32 %v1805_v52, %v794_v42  ;;  %v897_v2 = vsel %vm396_vm4, %v885_v45, %v886_v60  ;;  %v854_v36 = vmul.f32 %v1802_v51, %v1947_v24 }
 0x245   : > { %982 = vadd.xlane.f32.xlu1 %v981_v26  ;;  %v952_v30 = vadd.f32 %v936_v10, %v868_v61  ;;  %v937_v4 = vmul.f32 %v1808_v57, %v897_v2  ;;  %v793_v59 = vsel %vm259_vm3, %v781_v6, %v782_v23  ;;  %v887_v31 = vrot.slane %v1966_v53, 1 }
 0x246   : > { %v869_v9 = vadd.f32 %v853_v17, %v833_v1  ;;  %v834_v34 = vmul.f32 %v1805_v52, %v793_v59  ;;  %v1983_v32 = vmul.f32 %v1799_v3, %v529_v15  ;;  %v783_v48 = vrot.slane %v1966_v53, 7 }
 0x247   : > { %v984_v5 = vsel %vm533_vm5, %v952_v30, 0.0  ;;  %v896_v14 = vsel %vm396_vm4, %v886_v60, %v887_v31  ;;  %v855_v56 = vmul.f32 %v1802_v51, %v1966_v53  ;;  %v1994_v0 = vmul.f32 %v1799_v3, %v530_v43 }
 0x248   : > { %985 = vadd.xlane.f32.xlu0 %v984_v5  ;;  %v953_v12 = vadd.f32 %v937_v4, %v869_v9  ;;  %v870_v54 = vadd.f32 %v854_v36, %v834_v34  ;;  %v938_v15 = vmul.f32 %v1808_v57, %v896_v14  ;;  %v792_v16 = vsel %vm259_vm3, %v782_v23, %v783_v48 }
 0x249   : > { %v835_v44 = vmul.f32 %v1805_v52, %v792_v16  ;;  %v888_v25 = vrot.slane %v1983_v32, 1  ;;  %v784_v45 = vrot.slane %v1983_v32, 7  ;;  %v856_v29 = vmul.f32 %v1802_v51, %v1983_v32 }
 0x24a   : > { %v987_v43 = vsel %vm533_vm5, %v953_v12, 0.0  ;;  %v954_v11 = vadd.f32 %v938_v15, %v870_v54  ;;  %v889_v7 = vrot.slane %v1994_v0, 1  ;;  %v2009_v62 = vmul.f32 %v1799_v3, %v531_v13 }
 0x24b   : > { %988 = vadd.xlane.f32.xlu1 %v987_v43  ;;  %v871_v46 = vadd.f32 %v855_v56, %v835_v44  ;;  %v895_v28 = vsel %vm396_vm4, %v887_v31, %v888_v25  ;;  %v791_v41 = vsel %vm259_vm3, %v783_v48, %v784_v45  ;;  %v785_v6 = vrot.slane %v1994_v0, 7 }
 0x24c   : > { %v990_v17 = vsel %vm533_vm5, %v954_v11, 0.0  ;;  %v939_v58 = vmul.f32 %v1808_v57, %v895_v28  ;;  %v836_v40 = vmul.f32 %v1805_v52, %v791_v41  ;;  %v894_v39 = vsel %vm396_vm4, %v888_v25, %v889_v7 }
 0x24d   : > { %991 = vadd.xlane.f32.xlu0 %v990_v17  ;;  %v940_v13 = vmul.f32 %v1808_v57, %v894_v39  ;;  %v790_v10 = vsel %vm259_vm3, %v784_v45, %v785_v6  ;;  %v857_v60 = vmul.f32 %v1802_v51, %v1994_v0  ;;  %v890_v61 = vrot.slane %v2009_v62, 1 }
 0x24e   : > { %v955_v42 = vadd.f32 %v939_v58, %v871_v46  ;;  %v872_v23 = vadd.f32 %v856_v29, %v836_v40  ;;  %v837_v26 = vmul.f32 %v1805_v52, %v790_v10  ;;  %v2031_v1 = vmul.f32 %v1799_v3, %v532_v37 }
 0x24f   : > { %v893_v2 = vsel %vm396_vm4, %v889_v7, %v890_v61  ;;  %v876_v36 = vrot.slane %v1828_v22, 1  ;;  %v786_v30 = vrot.slane %v2009_v62, 7  ;;  %v844_v45 = vmul.f32 %v1802_v51, %v1828_v22 }
 0x250   : > { %v993_v4 = vsel %vm533_vm5, %v955_v42, 0.0  ;;  %v956_v59 = vadd.f32 %v940_v13, %v872_v23  ;;  %v873_v31 = vadd.f32 %v857_v60, %v837_v26  ;;  %v941_v9 = vmul.f32 %v1808_v57, %v893_v2 }
 0x251   : > { %994 = vadd.xlane.f32.xlu1 %v993_v4  ;;  %v787_v34 = vrot.slane %v2031_v1, 7  ;;  %v906_v21 = vsel %vm396_vm4, %v876_v36, %v877_v38  ;;  %v891_v37 = vrot.slane %v2031_v1, 1  ;;  %v859_v5 = vmul.f32 %v1802_v51, %v2031_v1 }
 0x252   : > { %v996_v3 = vsel %vm533_vm5, %v956_v59, 0.0  ;;  %v957_v48 = vadd.f32 %v941_v9, %v873_v31  ;;  %v789_v14 = vsel %vm259_vm3, %v785_v6, %v786_v30  ;;  %v858_v43 = vmul.f32 %v1802_v51, %v2009_v62 }
 0x253   : > { %997 = vadd.xlane.f32.xlu0 %v996_v3  ;;  %v803_v56 = vsel %vm259_vm3, %v787_v34, %v772_v63  ;;  %v788_v38 = vsel %vm259_vm3, %v786_v30, %v787_v34  ;;  %v907_v12 = vsel %vm396_vm4, %v891_v37, %v876_v36  ;;  %v838_v54 = vmul.f32 %v1805_v52, %v789_v14 }
 0x254   : > { %v999_v15 = vsel %vm533_vm5, %v957_v48, 0.0  ;;  %v804_v16 = vsel %vm211_vm2, 0.0, %v803_v56  ;;  %v839_v44 = vmul.f32 %v1805_v52, %v788_v38  ;;  %v923_v25 = vsel %vm242_vm6, 0.0, %v907_v12 }
 0x255   : > { %1000 = vadd.xlane.f32.xlu1 %v999_v15  ;;  %v824_v63 = vmul.f32 %v1805_v52, %v804_v16  ;;  %v943_v29 = vmul.f32 %v1808_v57, %v923_v25  ;;  %v892_v7 = vsel %vm396_vm4, %v890_v61, %v891_v37  ;;  %v928_v28 = vmul.f32 %v1808_v57, %v906_v21 }
 0x256   : > { %v875_v11 = vadd.f32 %v859_v5, %v839_v44  ;;  %v874_v35 = vadd.f32 %v858_v43, %v838_v54  ;;  %v942_v52 = vmul.f32 %v1808_v57, %v892_v7 }
 0x257   : > { %v860_v46 = vadd.f32 %v844_v45, %v824_v63 }
 0x258   : > { %v959_v41 = vadd.f32 %v943_v29, %v875_v11  ;;  %v958_v40 = vadd.f32 %v942_v52, %v874_v35 }
 0x259   : > { %v944_v6 = vadd.f32 %v928_v28, %v860_v46 }
 0x25a   : > { %v1005_v17 = vsel %vm533_vm5, %v959_v41, 0.0  ;;  %v1002_v51 = vsel %vm533_vm5, %v958_v40, 0.0 }
 0x25b   : > { %v960_v58 = vsel %vm533_vm5, %v944_v6, 0.0  ;;  %1006 = vadd.xlane.f32.xlu1 %v1005_v17 }
 0x25c   : > { %961 = vadd.xlane.f32.xlu0 %v960_v58 }
 0x260   : > { %1003 = vadd.xlane.f32.xlu0 %v1002_v51 }
 0x2c5   : > { %v968_v39 = vpop.xlane.xlu1 %967 }
 0x2c6   : > { %v1012_v13 = vadd.f32 %v2078_v19, %v968_v39  ;;  %v965_v10 = vpop.xlane.xlu0 %964 }
 0x2c7   : > { %v1011_v60 = vadd.f32 %v2078_v19, %v965_v10 }
 0x2c8   : > { %v1224_v57 = vmul.f32 -1.442695, %v1012_v13 }
 0x2c9   : > { %v1223_v61 = vmul.f32 -1.442695, %v1011_v60  ;;  %v971_v42 = vpop.xlane.xlu1 %970 }
 0x2ca   : > { %1286 = vpow2.f32 %v1224_v57  ;;  %v1013_v23 = vadd.f32 %v2078_v19, %v971_v42  ;;  %v974_v26 = vpop.xlane.xlu0 %973 }
 0x2cb   : > { %1288 = vpow2.f32 %v1223_v61  ;;  %v1014_v2 = vadd.f32 %v2078_v19, %v974_v26 }
 0x2cc   : > { %v1225_v36 = vmul.f32 -1.442695, %v1013_v23 }
 0x2cd   : > { %v1226_v30 = vmul.f32 -1.442695, %v1014_v2  ;;  %v977_v4 = vpop.xlane.xlu1 %976 }
 0x2ce   : > { %1290 = vpow2.f32 %v1225_v36  ;;  %v1015_v59 = vadd.f32 %v2078_v19, %v977_v4 }
 0x2cf   : > { %1292 = vpow2.f32 %v1226_v30 }
 0x2d0   : > { %v1227_v31 = vmul.f32 -1.442695, %v1015_v59  ;;  %v980_v9 = vpop.xlane.xlu0 %979 }
 0x2d1   : > { %v1016_v34 = vadd.f32 %v2078_v19, %v980_v9 }
 0x2d2   : > { %1294 = vpow2.f32 %v1227_v31  ;;  %v983_v21 = vpop.xlane.xlu1 %982 }
 0x2d3   : > { %v1228_v37 = vmul.f32 -1.442695, %v1016_v34  ;;  %v1017_v3 = vadd.f32 %v2078_v19, %v983_v21 }
 0x2d4   : > { %v1287_v48 = vpop.eup %1286 }
 0x2d5   : > { %v1289_v5 = vpop.eup %1288  ;;  %v1076_v14 = vadd.f32 1.0, %v1287_v48  ;;  %1296 = vpow2.f32 %v1228_v37  ;;  %v1229_v56 = vmul.f32 -1.442695, %v1017_v3  ;;  %v986_v38 = vpop.xlane.xlu0 %985 }
 0x2d6   : > { %v1075_v12 = vadd.f32 1.0, %v1289_v5  ;;  %v1018_v54 = vadd.f32 %v2078_v19, %v986_v38 }
 0x2d7   : > { %1298 = vrcp.f32 %v1076_v14 }
 0x2d8   : > { %v1291_v15 = vpop.eup %1290  ;;  %1300 = vrcp.f32 %v1075_v12  ;;  %v1230_v16 = vmul.f32 -1.442695, %v1018_v54  ;;  %v989_v44 = vpop.xlane.xlu1 %988 }
 0x2d9   : > { %v1293_v25 = vpop.eup %1292  ;;  %v1077_v63 = vadd.f32 1.0, %v1291_v15  ;;  %1302 = vpow2.f32 %v1229_v56  ;;  %v1019_v45 = vadd.f32 %v2078_v19, %v989_v44 }
 0x2da   : > { %v1078_v29 = vadd.f32 1.0, %v1293_v25  ;;  %1304 = vpow2.f32 %v1230_v16  ;;  %v992_v43 = vpop.xlane.xlu0 %991 }
 0x2db   : > { %1306 = vrcp.f32 %v1077_v63  ;;  %v1231_v11 = vmul.f32 -1.442695, %v1019_v45  ;;  %v1020_v7 = vadd.f32 %v2078_v19, %v992_v43 }
 0x2dc   : > { %v1295_v46 = vpop.eup %1294  ;;  %1308 = vrcp.f32 %v1078_v29 }
 0x2dd   : > { %v1079_v28 = vadd.f32 1.0, %v1295_v46  ;;  %1310 = vpow2.f32 %v1231_v11  ;;  %v1232_v35 = vmul.f32 -1.442695, %v1020_v7 }
 0x2de   : > { %v995_v41 = vpop.xlane.xlu1 %994 }
 0x2df   : > { %v1297_v6 = vpop.eup %1296  ;;  %1312 = vrcp.f32 %v1079_v28  ;;  %v1021_v52 = vadd.f32 %v2078_v19, %v995_v41 }
 0x2e0   : > { %v1080_v17 = vadd.f32 1.0, %v1297_v6  ;;  %1314 = vpow2.f32 %v1232_v35  ;;  %v998_v58 = vpop.xlane.xlu0 %997 }
 0x2e1   : > { %v1299_v40 = vpop.eup %1298  ;;  %v1233_v51 = vmul.f32 -1.442695, %v1021_v52  ;;  %v1022_v39 = vadd.f32 %v2078_v19, %v998_v58 }
 0x2e2   : > { %v1301_v13 = vpop.eup %1300  ;;  %v1124_v10 = vmul.f32 %v1299_v40, %v1818_v55  ;;  %1316 = vrcp.f32 %v1080_v17  ;;  %v1001_v60 = vpop.xlane.xlu1 %1000 }
 0x2e3   : > { %v1303_v57 = vpop.eup %1302  ;;  %v1123_v61 = vmul.f32 %v1301_v13, %v1813_v27  ;;  %1318 = vpow2.f32 %v1233_v51  ;;  %v1234_v42 = vmul.f32 -1.442695, %v1022_v39  ;;  %v1023_v23 = vadd.f32 %v2078_v19, %v1001_v60 }
 0x2e4   : > { %v1305_v26 = vpop.eup %1304  ;;  %1140 = vst.msk [vmem:[%s2096_s7 + $0x10] sm:$0xff] %vm533_vm5, %v1124_v10  ;;  %v1081_v2 = vadd.f32 1.0, %v1303_v57 }
 0x2e5   : > { %v1307_v36 = vpop.eup %1306  ;;  %1139 = vst.msk [vmem:[%s2096_s7 + $0x8] sm:$0xff] %vm533_vm5, %v1123_v61  ;;  %v1082_v30 = vadd.f32 1.0, %v1305_v26  ;;  %1320 = vpow2.f32 %v1234_v42  ;;  %v1235_v55 = vmul.f32 -1.442695, %v1023_v23 }
 0x2e6   : > { %v1309_v4 = vpop.eup %1308  ;;  %v1125_v59 = vmul.f32 %v1307_v36, %v1823_v18  ;;  %1322 = vrcp.f32 %v1081_v2 }
 0x2e7   : > { %v1311_v27 = vpop.eup %1310  ;;  %v1126_v31 = vmul.f32 %v1309_v4, %v1833_v49  ;;  %1324 = vrcp.f32 %v1082_v30 }
 0x2e8   : > { %1141 = vst.msk [vmem:[%s2096_s7 + $0x18] sm:$0xff] %vm533_vm5, %v1125_v59  ;;  %v1083_v9 = vadd.f32 1.0, %v1311_v27  ;;  %1326 = vpow2.f32 %v1235_v55  ;;  %v1007_v34 = vpop.xlane.xlu1 %1006 }
 0x2e9   : > { %v1313_v21 = vpop.eup %1312  ;;  %1142 = vst.msk [vmem:[%s2096_s7 + $0x20] sm:$0xff] %vm533_vm5, %v1126_v31  ;;  %v962_v37 = vpop.xlane.xlu0 %961  ;;  %v1025_v3 = vadd.f32 %v2078_v19, %v1007_v34 }
 0x2ea   : > { %v1315_v48 = vpop.eup %1314  ;;  %v1127_v18 = vmul.f32 %v1313_v21, %v1838_v33  ;;  %1328 = vrcp.f32 %v1083_v9  ;;  %v1010_v49 = vadd.f32 %v2078_v19, %v962_v37 }
 0x2eb   : > { %v1084_v5 = vadd.f32 1.0, %v1315_v48  ;;  %v1237_v14 = vmul.f32 -1.442695, %v1025_v3 }
 0x2ec   : > { %v1317_v56 = vpop.eup %1316  ;;  %1143 = vst.msk [vmem:[%s2096_s7 + $0x28] sm:$0xff] %vm533_vm5, %v1127_v18  ;;  %v1222_v38 = vmul.f32 -1.442695, %v1010_v49 }
 0x2ed   : > { %v1319_v12 = vpop.eup %1318  ;;  %v1128_v54 = vmul.f32 %v1317_v56, %v1843_v20  ;;  %1330 = vrcp.f32 %v1084_v5  ;;  %v1004_v15 = vpop.xlane.xlu0 %1003 }
 0x2ee   : > { %v1085_v16 = vadd.f32 1.0, %v1319_v12  ;;  %1332 = vpow2.f32 %v1222_v38  ;;  %v1024_v33 = vadd.f32 %v2078_v19, %v1004_v15 }
 0x2ef   : > { %v1321_v44 = vpop.eup %1320  ;;  %1144 = vst.msk [vmem:[%s2096_s7 + $0x30] sm:$0xff] %vm533_vm5, %v1128_v54  ;;  %1334 = vpow2.f32 %v1237_v14 }
 0x2f0   : > { %v1323_v25 = vpop.eup %1322  ;;  %1336 = vrcp.f32 %v1085_v16  ;;  %v1086_v63 = vadd.f32 1.0, %v1321_v44  ;;  %v1236_v45 = vmul.f32 -1.442695, %v1024_v33 }
 0x2f1   : > { %v1325_v29 = vpop.eup %1324  ;;  %v1129_v20 = vmul.f32 %v1323_v25, %v1848_v47 }
 0x2f2   : > { %v1327_v43 = vpop.eup %1326  ;;  %v1130_v11 = vmul.f32 %v1325_v29, %v1915_v50  ;;  %1338 = vrcp.f32 %v1086_v63 }
 0x2f3   : > { %1145 = vst.msk [vmem:[%s2096_s7 + $0x38] sm:$0xff] %vm533_vm5, %v1129_v20  ;;  %v1087_v19 = vadd.f32 1.0, %v1327_v43  ;;  %1340 = vpow2.f32 %v1236_v45 }
 0x2f4   : > { %v1329_v7 = vpop.eup %1328  ;;  %1146 = vst.msk [vmem:[%s2096_s7 + $0x40] sm:$0xff] %vm533_vm5, %v1130_v11 }
 0x2f5   : > { %v1131_v46 = vmul.f32 %v1329_v7, %v1934_v8  ;;  %1342 = vrcp.f32 %v1087_v19 }
 0x2f7   : > { %v1331_v28 = vpop.eup %1330  ;;  %1147 = vst.msk [vmem:[%s2096_s7 + $0x48] sm:$0xff] %vm533_vm5, %v1131_v46 }
 0x2f8   : > { %v1333_v47 = vpop.eup %1332  ;;  %v1132_v50 = vmul.f32 %v1331_v28, %v1947_v24 }
 0x2f9   : > { %v1335_v35 = vpop.eup %1334  ;;  %v1074_v41 = vadd.f32 1.0, %v1333_v47 }
 0x2fa   : > { %v1337_v6 = vpop.eup %1336  ;;  %1148 = vst.msk [vmem:[%s2096_s7 + $0x50] sm:$0xff] %vm533_vm5, %v1132_v50  ;;  %v1089_v52 = vadd.f32 1.0, %v1335_v35 }
 0x2fb   : > { %v1133_v17 = vmul.f32 %v1337_v6, %v1966_v53  ;;  %1344 = vrcp.f32 %v1074_v41 }
 0x2fc   : > { %v1339_v8 = vpop.eup %1338  ;;  %1346 = vrcp.f32 %v1089_v52 }
 0x2fd   : > { %v1341_v58 = vpop.eup %1340  ;;  %1149 = vst.msk [vmem:[%s2096_s7 + $0x58] sm:$0xff] %vm533_vm5, %v1133_v17  ;;  %v1134_v24 = vmul.f32 %v1339_v8, %v1983_v32 }
 0x2fe   : > { %v1088_v40 = vadd.f32 1.0, %v1341_v58 }
 0x2ff   : > { %v1343_v51 = vpop.eup %1342  ;;  %1150 = vst.msk [vmem:[%s2096_s7 + $0x60] sm:$0xff] %vm533_vm5, %v1134_v24 }
 0x300   : > { %v1135_v39 = vmul.f32 %v1343_v51, %v1994_v0  ;;  %1348 = vrcp.f32 %v1088_v40 }
 0x302   : > { %1151 = vst.msk [vmem:[%s2096_s7 + $0x68] sm:$0xff] %vm533_vm5, %v1135_v39 }
 0x305   : > { %v1345_v53 = vpop.eup %1344 }
 0x306   : > { %v1347_v13 = vpop.eup %1346  ;;  %v1122_v10 = vmul.f32 %v1345_v53, %v1828_v22 }
 0x307   : > { %v1137_v60 = vmul.f32 %v1347_v13, %v2031_v1 }
 0x308   : > { %1138 = vst.msk [vmem:[%s2096_s7] sm:$0xff] %vm533_vm5, %v1122_v10 }
 0x309   : > { %1153 = vst.msk [vmem:[%s2096_s7 + $0x78] sm:$0xff] %vm533_vm5, %v1137_v60 }
 0x30a   : > { %v1349_v32 = vpop.eup %1348 }
 0x30b   : > { %v1136_v57 = vmul.f32 %v1349_v32, %v2009_v62 }
 0x30d   : > { %1152 = vst.msk [vmem:[%s2096_s7 + $0x70] sm:$0xff] %vm533_vm5, %v1136_v57 }
 0x30e PF: > { %s14_s14 = sadd.s32 1, %s1356_s14  }
 0x30f   : > { %p11_p4 = scmp.ge.s32.totalorder %s14_s14, 4  }
 0x311   :  { %13 = sbr.rel (!%p11_p4) target bundleno = 2 (0x2), region = 62 }

</bundles_post_ra>
